<compile_context>
chip_gen: v6e
topology: v6e:2x2x1
jax: 0.10.0
libtpu: 0.0.40
codegen_flags: <defaults>
</compile_context>

<pallas_src>
import math

import jax
import jax.numpy as jnp
from jax.experimental import pallas as pl
from jax.experimental.pallas import tpu as pltpu


# ---------------------------------------------------------------------------
# Kernel
# ---------------------------------------------------------------------------
def _final_row_kernel(x_ref, w_ref, b_ref, o_ref):
    # x_ref: (BB, P, MB)       activation block: m on lanes, P on sublanes
    # w_ref: (window, P, MB)   weight block, window leading
    # b_ref: (window, MB)      bias block
    # o_ref: (BB, window, MB)  final output layout (lane axis = series axis)
    xv = x_ref[...].astype(jnp.float32)   # hoisted: loaded once per grid step
    bv = b_ref[...]                        # (window, MB), hoisted

    window = w_ref.shape[0]
    for wi in range(window):               # static unroll; window is small
        w_slab = w_ref[wi].astype(jnp.float32)        # (P, MB)
        # out[b, m] = sum_p x[b, p, m] * w[p, m]  -> cheap sublane reduce,
        # result already lane-aligned with the output tile.
        y = jnp.sum(xv * w_slab, axis=1)              # (BB, MB)
        o_ref[:, wi, :] = y + bv[wi:wi + 1, :]        # lane-dense store


# ---------------------------------------------------------------------------
# Tiling / VMEM sizing helpers
# ---------------------------------------------------------------------------
def _round_up(x, mult):
    return ((x + mult - 1) // mult) * mult


def _padded_block_bytes(shape, itemsize):
    """Bytes of a VMEM block after (8, 128) tile padding of the last two dims."""
    dims = list(shape)
    dims[-1] = _round_up(dims[-1], 128)
    if len(dims) >= 2:
        dims[-2] = _round_up(dims[-2], 8)
    n = 1
    for d in dims:
        n *= d
    return n * itemsize


def _working_set_bytes(block_b, block_m, P, window, in_itemsize):
    per_step = (_padded_block_bytes((block_b, P, block_m), in_itemsize)        # x
                + _padded_block_bytes((window, P, block_m), in_itemsize)       # w
                + _padded_block_bytes((window, block_m), 4)                    # bias
                + _padded_block_bytes((block_b, window, block_m), 4))          # out
    return 2 * per_step  # Pallas double-buffers every block by default


def _vmem_budget_and_limit():
    """Generation-aware (budget, vmem_limit) in bytes."""
    mib = 1024 * 1024
    cap = None
    try:
        cap = getattr(pltpu.get_tpu_info(), "vmem_capacity_bytes", None)
    except Exception:
        cap = None
    if cap is None or cap <= 64 * mib:
        # v7x: 64 MiB VMEM per TensorCore (also the safe default).
        return 45 * mib, 56 * mib
    # v5e / v6e: 128 MiB VMEM.
    return 96 * mib, 104 * mib


def _choose_blocks(batch, m_pad, P, window, vmem_budget_bytes, in_itemsize):
    """Pick (block_b, block_m): biggest padding-aware blocks that fit VMEM,
    with >= 2 total grid steps so the v7x megacore split happens."""
    m_tiles = m_pad // 128
    m_cands = [128 * d for d in range(m_tiles, 0, -1) if m_tiles % d == 0]
    b_cands = [d for d in range(batch, 0, -1) if batch % d == 0]

    block_b, block_m = 1, 128  # minimal legal fallback
    for bb in b_cands:                                   # biggest tiles first
        fitting = [bm for bm in m_cands
                   if _working_set_bytes(bb, bm, P, window, in_itemsize)
                   <= vmem_budget_bytes]
        if fitting:
            block_b, block_m = bb, fitting[0]
            break

    # Guarantee >= 2 grid steps (v7x has 2 TensorCores; neutral on v5e/v6e).
    if (batch // block_b) * (m_pad // block_m) < 2:
        if m_pad // block_m == 1 and len(m_cands) > 1:
            block_m = m_cands[1]
        elif batch // block_b == 1 and len(b_cands) > 1:
            block_b = b_cands[1]
    return block_b, block_m


# ---------------------------------------------------------------------------
# Wrapper
# ---------------------------------------------------------------------------
def final_row_forward(x, weight, bias, *, block_b=None, block_m=None,
                      use_bf16=False):
    """x: [batch, m, P] f32; weight: [m, P, window] f32; bias: [m, window] f32.

    use_bf16=True casts x/weight to bf16 in HBM (f32 accumulation in-kernel);
    it halves HBM traffic on this bandwidth-bound kernel but changes input
    precision, so it is off by default.
    """
    batch, m, P = x.shape
    m_w, P_w, window = weight.shape
    assert (m_w, P_w) == (m, P), "weight shape must be [m, P, window]"
    assert bias.shape == (m, window), "bias shape must be [m, window]"

    m_pad = _round_up(m, 128)
    in_dtype = jnp.bfloat16 if use_bf16 else jnp.float32
    in_itemsize = 2 if use_bf16 else 4

    vmem_budget, vmem_limit = _vmem_budget_and_limit()
    if block_b is None or block_m is None:
        bb, bm = _choose_blocks(batch, m_pad, P, window, vmem_budget, in_itemsize)
        block_b = bb if block_b is None else block_b
        block_m = bm if block_m is None else block_m
    assert batch % block_b == 0
    assert m_pad % block_m == 0 and block_m % 128 == 0

    # Relayout + zero-pad in the wrapper (one pass over x, parameter-sized for
    # w/bias): series axis m goes to lanes, contraction axis P to sublanes.
    pad_m = m_pad - m
    x_t = jnp.transpose(x, (0, 2, 1))          # (batch, P, m)
    w_t = jnp.transpose(weight, (2, 1, 0))     # (window, P, m)
    b_t = jnp.transpose(bias, (1, 0))          # (window, m)
    if pad_m:
        x_t = jnp.pad(x_t, ((0, 0), (0, 0), (0, pad_m)))
        w_t = jnp.pad(w_t, ((0, 0), (0, 0), (0, pad_m)))
        b_t = jnp.pad(b_t, ((0, 0), (0, pad_m)))
    x_t = x_t.astype(in_dtype)
    w_t = w_t.astype(in_dtype)
    b_t = b_t.astype(jnp.float32)

    out = pl.pallas_call(
        _final_row_kernel,
        out_shape=jax.ShapeDtypeStruct((batch, window, m_pad), jnp.float32),
        grid_spec=pltpu.PrefetchScalarGridSpec(
            num_scalar_prefetch=0,
            grid=(batch // block_b, m_pad // block_m),
            in_specs=[
                pl.BlockSpec((block_b, P, block_m), lambda b, j: (b, 0, j)),
                pl.BlockSpec((window, P, block_m), lambda b, j: (0, 0, j)),
                pl.BlockSpec((window, block_m), lambda b, j: (0, j)),
            ],
            out_specs=pl.BlockSpec((block_b, window, block_m),
                                   lambda b, j: (b, 0, j)),
        ),
        compiler_params=pltpu.CompilerParams(
            dimension_semantics=("parallel", "parallel"),
            vmem_limit_bytes=vmem_limit,
        ),
    )(x_t, w_t, b_t)

    if pad_m:
        out = out[:, :, :m]                    # drop zero-padded series columns
    if window == 1:
        out = out[:, 0, :]                     # PyTorch window==1 branch: [batch, m]
    return out


# ---------------------------------------------------------------------------
# Parameter init (matches the PyTorch __init__ initializers)
# ---------------------------------------------------------------------------
def init_params(key, m, P, window):
    k_w, k_b = jax.random.split(key)
    # kaiming_uniform_(mode='fan_in', nonlinearity='relu') on [m, P, window]:
    # fan_in = P * window, gain = sqrt(2), bound = gain * sqrt(3 / fan_in)
    fan_in = P * window
    w_bound = math.sqrt(2.0) * math.sqrt(3.0 / fan_in)
    weight = jax.random.uniform(
        k_w, (m, P, window), jnp.float32, minval=-w_bound, maxval=w_bound)
    # bias ~ U(-1/sqrt(fan_in), 1/sqrt(fan_in))
    b_bound = 1.0 / math.sqrt(fan_in)
    bias = jax.random.uniform(
        k_b, (m, window), jnp.float32, minval=-b_bound, maxval=b_bound)
    return weight, bias


if __name__ == "__main__":
    # Small shapes consistent with the module: p_list=[3,5] -> p_sum = P = 8,
    # m = 6 series, window (pre_win) = 4, batch = 4.
    batch, m, P, window = 4, 6, 8, 4

    key = jax.random.PRNGKey(0)
    k_x, k_param = jax.random.split(key)

    x = jax.random.normal(k_x, (batch, m, P), dtype=jnp.float32)
    weight, bias = init_params(k_param, m, P, window)

    out = jax.block_until_ready(final_row_forward(x, weight, bias))

    # Exact-f32 elementwise reference.
    ref_bjw = jnp.sum(x[:, :, :, None] * weight[None, :, :, :], axis=2) + bias[None]
    ref = jnp.transpose(ref_bjw, (0, 2, 1))            # [batch, window, m]
    assert out.shape == (batch, window, m)
    assert jnp.allclose(out, ref, atol=1e-5, rtol=1e-5)

    # window == 1 branch (PyTorch returns [batch, m]).
    w1, b1 = init_params(jax.random.PRNGKey(1), m, P, 1)
    out1 = jax.block_until_ready(final_row_forward(x, w1, b1))
    ref1 = jnp.sum(x * w1[None, :, :, 0], axis=-1) + b1[None, :, 0]
    assert out1.shape == (batch, m)
    assert jnp.allclose(out1, ref1, atol=1e-5, rtol=1e-5)

    # Odd shapes: P not a multiple of 8, batch not a power of two.
    b2, m2, P2, win2 = 3, 5, 5, 2
    x2 = jax.random.normal(jax.random.PRNGKey(2), (b2, m2, P2), dtype=jnp.float32)
    w2, bias2 = init_params(jax.random.PRNGKey(3), m2, P2, win2)
    out2 = jax.block_until_ready(final_row_forward(x2, w2, bias2))
    ref2 = jnp.transpose(
        jnp.sum(x2[:, :, :, None] * w2[None], axis=2) + bias2[None], (0, 2, 1))
    assert out2.shape == (b2, win2, m2)
    assert jnp.allclose(out2, ref2, atol=1e-5, rtol=1e-5)

    print("KERNEL_OK")
</pallas_src>

<mosaic_0001>
module attributes {stable_mosaic.version = 11 : i64} {
  func.func @_final_row_kernel(%arg0: i32, %arg1: i32, %arg2: memref<2x8x128xf32, #tpu.memory_space<vmem>>, %arg3: memref<4x8x128xf32, #tpu.memory_space<vmem>>, %arg4: memref<4x128xf32, #tpu.memory_space<vmem>>, %arg5: memref<2x4x128xf32, #tpu.memory_space<vmem>>) attributes {dimension_semantics = [#tpu.dimension_semantics<parallel>, #tpu.dimension_semantics<parallel>], iteration_bounds = array<i64: 2, 1>, scalar_prefetch = 0 : i64, scratch_operands = 0 : i64, tpu.core_type = #tpu.core_type<tc>, window_params = [{transform_indices = @transform_0, window_bounds = array<i64: 2, 8, 128>}, {transform_indices = @transform_1, window_bounds = array<i64: 4, 8, 128>}, {transform_indices = @transform_2, window_bounds = array<i64: 4, 128>}, {transform_indices = @transform_3, window_bounds = array<i64: 2, 4, 128>}]} {
    %c0 = arith.constant 0 : index
    %c0_0 = arith.constant 0 : index
    %c0_1 = arith.constant 0 : index
    %0 = vector.load %arg2[%c0, %c0_0, %c0_1] : memref<2x8x128xf32, #tpu.memory_space<vmem>>, vector<2x8x128xf32>
    %c0_2 = arith.constant 0 : index
    %c0_3 = arith.constant 0 : index
    %1 = vector.load %arg4[%c0_2, %c0_3] : memref<4x128xf32, #tpu.memory_space<vmem>>, vector<4x128xf32>
    %c0_4 = arith.constant 0 : index
    %c0_5 = arith.constant 0 : index
    %c0_6 = arith.constant 0 : index
    %2 = vector.load %arg3[%c0_4, %c0_5, %c0_6] : memref<4x8x128xf32, #tpu.memory_space<vmem>>, vector<1x8x128xf32>
    %3 = vector.shape_cast %2 : vector<1x8x128xf32> to vector<8x128xf32>
    %4 = vector.shape_cast %3 : vector<8x128xf32> to vector<1x8x128xf32>
    %5 = vector.broadcast %4 : vector<1x8x128xf32> to vector<2x8x128xf32>
    %6 = arith.mulf %0, %5 : vector<2x8x128xf32>
    %cst = arith.constant dense<0.000000e+00> : vector<2x128xf32>
    %7 = vector.multi_reduction <add>, %6, %cst [1] : vector<2x8x128xf32> to vector<2x128xf32>
    %8 = vector.extract_strided_slice %1 {offsets = [0, 0], sizes = [1, 128], strides = [1, 1]} : vector<4x128xf32> to vector<1x128xf32>
    %9 = vector.broadcast %8 : vector<1x128xf32> to vector<2x128xf32>
    %10 = arith.addf %7, %9 : vector<2x128xf32>
    %c0_7 = arith.constant 0 : index
    %c0_8 = arith.constant 0 : index
    %c0_9 = arith.constant 0 : index
    %11 = vector.load %arg5[%c0_7, %c0_8, %c0_9] : memref<2x4x128xf32, #tpu.memory_space<vmem>>, vector<2x1x128xf32>
    %12 = vector.shape_cast %11 : vector<2x1x128xf32> to vector<2x128xf32>
    %13 = vector.shape_cast %10 : vector<2x128xf32> to vector<2x1x128xf32>
    tpu.vector_store %arg5[%c0_7, %c0_8, %c0_9], %13 {strides = array<i32>} : memref<2x4x128xf32, #tpu.memory_space<vmem>>, vector<2x1x128xf32>,
    %c1 = arith.constant 1 : index
    %c0_10 = arith.constant 0 : index
    %c0_11 = arith.constant 0 : index
    %14 = vector.load %arg3[%c1, %c0_10, %c0_11] : memref<4x8x128xf32, #tpu.memory_space<vmem>>, vector<1x8x128xf32>
    %15 = vector.shape_cast %14 : vector<1x8x128xf32> to vector<8x128xf32>
    %16 = vector.shape_cast %15 : vector<8x128xf32> to vector<1x8x128xf32>
    %17 = vector.broadcast %16 : vector<1x8x128xf32> to vector<2x8x128xf32>
    %18 = arith.mulf %0, %17 : vector<2x8x128xf32>
    %cst_12 = arith.constant dense<0.000000e+00> : vector<2x128xf32>
    %19 = vector.multi_reduction <add>, %18, %cst_12 [1] : vector<2x8x128xf32> to vector<2x128xf32>
    %20 = vector.extract_strided_slice %1 {offsets = [1, 0], sizes = [1, 128], strides = [1, 1]} : vector<4x128xf32> to vector<1x128xf32>
    %21 = vector.broadcast %20 : vector<1x128xf32> to vector<2x128xf32>
    %22 = arith.addf %19, %21 : vector<2x128xf32>
    %c0_13 = arith.constant 0 : index
    %c1_14 = arith.constant 1 : index
    %c0_15 = arith.constant 0 : index
    %23 = vector.load %arg5[%c0_13, %c1_14, %c0_15] : memref<2x4x128xf32, #tpu.memory_space<vmem>>, vector<2x1x128xf32>
    %24 = vector.shape_cast %23 : vector<2x1x128xf32> to vector<2x128xf32>
    %25 = vector.shape_cast %22 : vector<2x128xf32> to vector<2x1x128xf32>
    tpu.vector_store %arg5[%c0_13, %c1_14, %c0_15], %25 {strides = array<i32>} : memref<2x4x128xf32, #tpu.memory_space<vmem>>, vector<2x1x128xf32>,
    %c2 = arith.constant 2 : index
    %c0_16 = arith.constant 0 : index
    %c0_17 = arith.constant 0 : index
    %26 = vector.load %arg3[%c2, %c0_16, %c0_17] : memref<4x8x128xf32, #tpu.memory_space<vmem>>, vector<1x8x128xf32>
    %27 = vector.shape_cast %26 : vector<1x8x128xf32> to vector<8x128xf32>
    %28 = vector.shape_cast %27 : vector<8x128xf32> to vector<1x8x128xf32>
    %29 = vector.broadcast %28 : vector<1x8x128xf32> to vector<2x8x128xf32>
    %30 = arith.mulf %0, %29 : vector<2x8x128xf32>
    %cst_18 = arith.constant dense<0.000000e+00> : vector<2x128xf32>
    %31 = vector.multi_reduction <add>, %30, %cst_18 [1] : vector<2x8x128xf32> to vector<2x128xf32>
    %32 = vector.extract_strided_slice %1 {offsets = [2, 0], sizes = [1, 128], strides = [1, 1]} : vector<4x128xf32> to vector<1x128xf32>
    %33 = vector.broadcast %32 : vector<1x128xf32> to vector<2x128xf32>
    %34 = arith.addf %31, %33 : vector<2x128xf32>
    %c0_19 = arith.constant 0 : index
    %c2_20 = arith.constant 2 : index
    %c0_21 = arith.constant 0 : index
    %35 = vector.load %arg5[%c0_19, %c2_20, %c0_21] : memref<2x4x128xf32, #tpu.memory_space<vmem>>, vector<2x1x128xf32>
    %36 = vector.shape_cast %35 : vector<2x1x128xf32> to vector<2x128xf32>
    %37 = vector.shape_cast %34 : vector<2x128xf32> to vector<2x1x128xf32>
    tpu.vector_store %arg5[%c0_19, %c2_20, %c0_21], %37 {strides = array<i32>} : memref<2x4x128xf32, #tpu.memory_space<vmem>>, vector<2x1x128xf32>,
    %c3 = arith.constant 3 : index
    %c0_22 = arith.constant 0 : index
    %c0_23 = arith.constant 0 : index
    %38 = vector.load %arg3[%c3, %c0_22, %c0_23] : memref<4x8x128xf32, #tpu.memory_space<vmem>>, vector<1x8x128xf32>
    %39 = vector.shape_cast %38 : vector<1x8x128xf32> to vector<8x128xf32>
    %40 = vector.shape_cast %39 : vector<8x128xf32> to vector<1x8x128xf32>
    %41 = vector.broadcast %40 : vector<1x8x128xf32> to vector<2x8x128xf32>
    %42 = arith.mulf %0, %41 : vector<2x8x128xf32>
    %cst_24 = arith.constant dense<0.000000e+00> : vector<2x128xf32>
    %43 = vector.multi_reduction <add>, %42, %cst_24 [1] : vector<2x8x128xf32> to vector<2x128xf32>
    %44 = vector.extract_strided_slice %1 {offsets = [3, 0], sizes = [1, 128], strides = [1, 1]} : vector<4x128xf32> to vector<1x128xf32>
    %45 = vector.broadcast %44 : vector<1x128xf32> to vector<2x128xf32>
    %46 = arith.addf %43, %45 : vector<2x128xf32>
    %c0_25 = arith.constant 0 : index
    %c3_26 = arith.constant 3 : index
    %c0_27 = arith.constant 0 : index
    %47 = vector.load %arg5[%c0_25, %c3_26, %c0_27] : memref<2x4x128xf32, #tpu.memory_space<vmem>>, vector<2x1x128xf32>
    %48 = vector.shape_cast %47 : vector<2x1x128xf32> to vector<2x128xf32>
    %49 = vector.shape_cast %46 : vector<2x128xf32> to vector<2x1x128xf32>
    tpu.vector_store %arg5[%c0_25, %c3_26, %c0_27], %49 {strides = array<i32>} : memref<2x4x128xf32, #tpu.memory_space<vmem>>, vector<2x1x128xf32>,
    return
  }
  func.func @transform_0(%arg0: i32, %arg1: i32) -> (i32, i32, i32) {
    %c0_i32 = arith.constant 0 : i32
    %c0_i32_0 = arith.constant 0 : i32
    return %arg0, %c0_i32, %arg1 : i32, i32, i32
  }
  func.func @transform_1(%arg0: i32, %arg1: i32) -> (i32, i32, i32) {
    %c0_i32 = arith.constant 0 : i32
    %c0_i32_0 = arith.constant 0 : i32
    %c0_i32_1 = arith.constant 0 : i32
    return %c0_i32, %c0_i32_0, %arg1 : i32, i32, i32
  }
  func.func @transform_2(%arg0: i32, %arg1: i32) -> (i32, i32) {
    %c0_i32 = arith.constant 0 : i32
    %c0_i32_0 = arith.constant 0 : i32
    return %c0_i32, %arg1 : i32, i32
  }
  func.func @transform_3(%arg0: i32, %arg1: i32) -> (i32, i32, i32) {
    %c0_i32 = arith.constant 0 : i32
    %c0_i32_0 = arith.constant 0 : i32
    return %arg0, %c0_i32, %arg1 : i32, i32, i32
  }
}

</mosaic_0001>

<bundles_post_ra>
// kernel: tpu_custom_call.1
= control target key start
LH: loop header
LB: loop body
LE: loop exit
PB: predicated region body
PF: predicated region fallthrough
CT: control target
= control target key end

     0   :  { %8 = vsyncpa [#allocation3], 0  ;;  %s983_s0 = inlined_call_operand.hbm [shape: f32[4,8,128], index: 0, kind: input, shape index: {}]   ;;  %s984_s1 = inlined_call_operand.hbm [shape: f32[4,8,128], index: 1, kind: input, shape index: {}]   ;;  %s985_s2 = inlined_call_operand.hbm [shape: f32[4,128], index: 2, kind: input, shape index: {}]   ;;  %s986_s3 = inlined_call_operand.hbm [shape: f32[4,4,128], index: 3, kind: output, shape index: {}]  }
   0x1   :  { %10 = vsyncpa [#allocation3 + $0x1], 0 }
   0x2   :  { %11 = vsyncpa [#allocation6], 0 }
   0x3   :  { %12 = vsyncpa [#allocation4], 0 }
   0x4   :  { %14 = vsyncpa [#allocation4 + $0x1], 0  ;;  %s772_s12 = smov 0   ;;  %s774_s13 = smov 0  }
   0x5   :  { %s776_s14 = smov 0   ;;  %s778_s15 = smov 0  }
   0x6   :  { %s780_s16 = smov 0   ;;  %s782_s17 = smov 0  }
   0x7 LB: > { %s470_s18 = sadd.s32 4294967295, %s742_s17   ;;  %s471_s19 = sadd.s32 4294967294, %s742_s17   ;;  %s742_s17 = sphi %s782_s17, %s20_s17   ;;  %s738_s16 = sphi %s780_s16, %s1003_s16   ;;  %s734_s15 = sphi %s778_s15, %s1002_s15   ;;  %s730_s14 = sphi %s776_s14, %s1001_s14   ;;  %s726_s13 = sphi %s774_s13, %s1000_s13   ;;  %s722_s12 = sphi %s772_s12, %s999_s12  }
   0x8   : > { %p54_p0 = scmp.ne.s32.totalorder %s726_s13, %s722_s12  ;;  %p806_p1 = scmp.eq.s32.totalorder %s470_s18, 0 }
   0x9   : > { %p810_p2 = scmp.eq.s32.totalorder %s470_s18, 1  ;;  %p138_p3 = scmp.eq.s32.totalorder %s471_s19, 1 }
   0xa   : > { %p816_p4 = por %p806_p1, %p54_p0  ;;  %p472_p5 = scmp.ge.s32.totalorder %s742_s17, 1 }
   0xb   : > { %p821_p6 = por %p138_p3, %p54_p0  ;;  %p145_p7 = scmp.lt.s32.totalorder %s742_s17, 3 }
   0xc   : > { %s744_s25 = smov [#allocation5]   ;;  %s745_s28 = smov [#allocation7]  }
   0xd   : > { %s991_s23 = scalar_select %p821_p6, 1, 0 }
   0xe   : > { %p826_p8 = pnand %p472_p5, %p145_p7  ;;  %s159_s26 = sshll.u32 %s744_s25, 4  ;;  %s160_s26 = int_to_ptr.vmem [resolvable:$true] %s159_s26 }
   0xf   : > { %s175_s29 = sshll.u32 %s745_s28, 4  ;;  %s589_s30 = scalar_lea.vmem %s160_s26, 512  ;;  %s176_s29 = int_to_ptr.vmem [resolvable:$true] %s175_s29 }
  0x10   : > { %p503_p9 = pneg %p826_p8  ;;  %p590_p13 = scmp.ne.s32.totalorder %s160_s26, %s589_s30 }
  0x11   : > { %p597_p5 = scmp.lt.s32.totalorder %s160_s26, %s160_s26  ;;  %p598_p7 = scmp.lt.s32.totalorder %s589_s30, %s589_s30 }
  0x12   : > { %p835_p11 = pnand %p503_p9, %p806_p1 }
  0x13   : > { %p599_p10 = por %p598_p7, %p597_p5 }
  0x14   : > { %p580_p12 = pneg %p835_p11 }
  0x16   : > { %p592_p0 = pnand %p590_p13, %p580_p12 }
  0x18   : > { %p593_p3 = pneg %p592_p0 }
  0x1a   : > { %p600_p9 = pnand %p599_p10, %p593_p3 }
  0x1c   : > { %603 = shalt.err (!%p600_p9)
}
  0x1d   : > { %s987_s4 = smov 128   ;;  %s747_s5 = smov 8  }
  0x1e   : > { %506 = dma.hbm_to_vmem [thread:$0]  (!%p835_p11), %s984_s1, 512, %s160_s26, [#allocation6], %s987_s4, %s987_s4, %s747_s5  }
  0x1f   : > { %s615_s8 = scalar_lea.vmem %s176_s29, 64  ;;  %p623_p10 = scmp.lt.s32.totalorder %s176_s29, %s176_s29 }
  0x20   : > { %p616_p13 = scmp.ne.s32.totalorder %s176_s29, %s615_s8  ;;  %p624_p3 = scmp.lt.s32.totalorder %s615_s8, %s615_s8 }
  0x22   : > { %p618_p0 = pnand %p616_p13, %p580_p12  ;;  %p625_p7 = por %p624_p3, %p623_p10 }
  0x24   : > { %p619_p5 = pneg %p618_p0 }
  0x26   : > { %p626_p9 = pnand %p625_p7, %p619_p5 }
  0x28   : > { %629 = shalt.err (!%p626_p9)
}
  0x29   : > { %509 = dma.hbm_to_vmem [thread:$0]  (!%p835_p11), %s985_s2, 64, %s176_s29, [#allocation6]  }
  0x2a   : > { %s32_s11 = sadd.s32 1, %s738_s16  ;;  %s41_s18 = sadd.s32 1, %s730_s14 }
  0x2b   : > { %p34_p12 = scmp.ge.s32.totalorder %s32_s11, 2  ;;  %p48_p13 = scmp.ne.s32.totalorder %s730_s14, %s726_s13 }
  0x2c   : > { %p49_p0 = scmp.eq.s32.totalorder %s742_s17, 0  ;;  %p520_p5 = scmp.lt.s32.totalorder %s742_s17, 2 }
  0x2d   : > { %s1005_s11 = smov (%p34_p12, %s32_s11), 0  ;;  %p870_p3 = por %p810_p2, %p48_p13 }
  0x2e   : > { %p50_p10 = por %p49_p0, %p48_p13  ;;  %s36_s25 = ssub.s32 %s738_s16, %s1005_s11 }
  0x2f   : > { %s186_s26 = sand.u32 1, %s730_s14   ;;  %p39_p7 = scmp.eq.s32.totalorder %s36_s25, 0 }
  0x30   : > { %s476_s27 = sshll.u32 %s186_s26, 4  ;;  %s489_s28 = sshll.u32 %s738_s16, 8 }
  0x31   : > { %s879_s29 = scalar_select %p39_p7, %s730_s14, %s41_s18  }
  0x32   : > { %s197_s7 = scalar_lea.hbm %s983_s0, %s489_s28  ;;  %s190_s8 = scalar_lea.vmem [#allocation2], %s476_s27 }
  0x33   : > { %s198_s9 = sshll.u32 %s190_s8, 4  ;;  %p886_p11 = pnand %p520_p5, %p50_p10  ;;  %s199_s9 = int_to_ptr.vmem [resolvable:$true] %s198_s9 }
  0x34   : > { %s187_s10 = scalar_lea.sflag [#allocation3], %s186_s26  ;;  %s643_s25 = scalar_lea.vmem %s199_s9, 256 }
  0x35   : > { %p632_p2 = pneg %p886_p11  ;;  %p644_p9 = scmp.ne.s32.totalorder %s199_s9, %s643_s25 }
  0x36   : > { %s748_s18 = smov [#allocation2]  }
  0x37   : > { %p646_p12 = pnand %p644_p9, %p632_p2  ;;  %s648_s4 = sshll.u32 %s748_s18, 4  ;;  %s649_s4 = int_to_ptr.vmem [resolvable:$false] %s648_s4 }
  0x38   : > { %s650_s28 = scalar_lea.vmem %s649_s4, 512  ;;  %p651_p0 = scmp.lt.s32.totalorder %s199_s9, %s649_s4 }
  0x39   : > { %p647_p13 = pneg %p646_p12  ;;  %p652_p7 = scmp.lt.s32.totalorder %s650_s28, %s643_s25 }
  0x3b   : > { %p653_p6 = por %p652_p7, %p651_p0 }
  0x3d   : > { %p654_p5 = pnand %p653_p6, %p647_p13 }
  0x3f   : > { %657 = shalt.err (!%p654_p5)
}
  0x40   : > { %s996_s27 = smov 128   ;;  %210 = sbr.rel (%p826_p8) target bundleno = 110 (0x6e), region = 32 }
  0x41   : > { %513 = dma.hbm_to_vmem [thread:$0]  (!%p886_p11), %s197_s7, 256, %s199_s9, %s187_s10, %s996_s27, %s996_s27, %s747_s5  }
  0x42   : > { %s900_s26 = sand.u32 (!%p826_p8), 1, %s726_s13  }
  0x43   : > { %s480_s4 = sshll.u32 (!%p826_p8), %s900_s26, 4  ;;  %s213_s30 = scalar_lea.sflag (!%p826_p8), [#allocation3], %s900_s26 }
  0x44   : > { %s216_s6 = scalar_lea.vmem (!%p826_p8), [#allocation2], %s480_s4 }
  0x45   : > { %709 = dma.done.wait (%p816_p4), %s213_s30, 256  }
  0x46   : > { %711 = vsyncadd (%p816_p4), %s213_s30, 4294967040 }
  0x47   : > { %713 = dma.done.wait (%p806_p1), [#allocation6], 576  }
  0x48   : > { %715 = vsyncadd (%p806_p1), [#allocation6], 4294966720  ;;  %v267_v0 = vlaneseq  ;;  %v249_v6 = vld [vmem:[%s216_s6] sm:$0xff]  ;;  %v250_v11 = vld [vmem:[%s216_s6 + $0x8] sm:$0xff]  ;;  %s483_s20 = sshll.u32 %s900_s26, 3  ;;  %s490_s5 = sshll.u32 %s734_s15, 7 }
  0x49   : > { %v251_v7 = vld [vmem:[#allocation7] sm:$0xf]  ;;  %v276_v12 = vld [vmem:[#allocation5 + $0x8] sm:$0xff]  ;;  %v300_v14 = vld [vmem:[#allocation5 + $0x10] sm:$0xff]  ;;  %s246_s22 = scalar_lea.vmem [#allocation8], %s483_s20  ;;  %s934_s8 = scalar_lea.hbm %s986_s3, %s490_s5 }
  0x4a   : > { %v268_v1 = vshrl.u32 %v267_v0, 7  ;;  %v252_v8 = vld [vmem:[#allocation5] sm:$0xff]  ;;  %v277_v17 = vmul.f32 %v276_v12, %v249_v6  ;;  %v278_v18 = vmul.f32 %v276_v12, %v250_v11  ;;  %v301_v19 = vmul.f32 %v300_v14, %v249_v6  ;;  %v324_v20 = vld [vmem:[#allocation5 + $0x18] sm:$0xff]  ;;  %s362_s24 = sshll.u32 %s246_s22, 4  ;;  %s348_s9 = scalar_lea.sflag [#allocation4], %s900_s26  ;;  %s929_s24 = int_to_ptr.vmem [resolvable:$true] %s362_s24 }
  0x4b   : > { %v253_v9 = vmul.f32 %v252_v8, %v249_v6  ;;  %v254_v16 = vmul.f32 %v252_v8, %v250_v11  ;;  %v302_v22 = vmul.f32 %v300_v14, %v250_v11  ;;  %v325_v23 = vmul.f32 %v324_v20, %v249_v6  ;;  %s658_s21 = scalar_lea.vmem %s929_s24, 128  ;;  %s749_s10 = smov [#allocation8]  }
  0x4c   : > { %v269_v2 = vsub.s32 0, %v268_v1  ;;  %v293_v3 = vsub.s32 1, %v268_v1  ;;  %v317_v4 = vsub.s32 2, %v268_v1  ;;  %v341_v5 = vsub.s32 3, %v268_v1  ;;  %p659_p1 = scmp.ne.s32.totalorder %s929_s24, %s658_s21  ;;  %s662_s25 = sshll.u32 %s749_s10, 4  ;;  %s663_s25 = int_to_ptr.vmem [resolvable:$false] %s662_s25 }
  0x4d   : > { %v255_v21 = vrot.slane %v253_v9, 4  ;;  %v261_v25 = vrot.slane %v254_v16, 4  ;;  %v279_v26 = vrot.slane %v277_v17, 4  ;;  %v285_v27 = vrot.slane %v278_v18, 4  ;;  %s664_s18 = scalar_lea.vmem %s663_s25, 256  ;;  %p665_p8 = scmp.lt.s32.totalorder %s929_s24, %s663_s25 }
  0x4e   : > { %v912_v10 = vrot.slane %v251_v7, %v269_v2  ;;  %v914_v13 = vrot.slane %v251_v7, %v293_v3  ;;  %v916_v15 = vrot.slane %v251_v7, %v317_v4  ;;  %v918_v24 = vrot.slane %v251_v7, %v341_v5  ;;  %p660_p4 = pnand %p659_p1, %p870_p3  ;;  %p666_p10 = scmp.lt.s32.totalorder %s664_s18, %s658_s21 }
  0x4f   : > { %v303_v28 = vrot.slane %v301_v19, 4  ;;  %v256_v29 = vadd.f32 %v255_v21, %v253_v9  ;;  %v309_v30 = vrot.slane %v302_v22, 4  ;;  %v327_v31 = vrot.slane %v325_v23, 4 }
  0x50   : > { %v326_v32 = vmul.f32 %v324_v20, %v250_v11  ;;  %v262_v33 = vadd.f32 %v261_v25, %v254_v16  ;;  %v280_v34 = vadd.f32 %v279_v26, %v277_v17  ;;  %v286_v35 = vadd.f32 %v285_v27, %v278_v18  ;;  %p661_p6 = pneg %p660_p4  ;;  %p667_p11 = por %p666_p10, %p665_p8 }
  0x51   : > { %v304_v36 = vadd.f32 %v303_v28, %v301_v19  ;;  %v257_v37 = vrot.slane %v256_v29, 2  ;;  %v310_v38 = vadd.f32 %v309_v30, %v302_v22  ;;  %v328_v39 = vadd.f32 %v327_v31, %v325_v23 }
  0x52   : > { %v333_v40 = vrot.slane %v326_v32, 4  ;;  %v263_v41 = vrot.slane %v262_v33, 2  ;;  %v281_v42 = vrot.slane %v280_v34, 2  ;;  %v287_v43 = vrot.slane %v286_v35, 2  ;;  %p668_p2 = pnand %p667_p11, %p661_p6 }
  0x53   : > { %v305_v44 = vrot.slane %v304_v36, 2  ;;  %v258_v45 = vadd.f32 %v257_v37, %v256_v29  ;;  %v311_v46 = vrot.slane %v310_v38, 2  ;;  %v329_v47 = vrot.slane %v328_v39, 2 }
  0x54   : > { %v334_v48 = vadd.f32 %v333_v40, %v326_v32  ;;  %v264_v49 = vadd.f32 %v263_v41, %v262_v33  ;;  %v282_v50 = vadd.f32 %v281_v42, %v280_v34  ;;  %v288_v51 = vadd.f32 %v287_v43, %v286_v35 }
  0x55   : > { %v306_v52 = vadd.f32 %v305_v44, %v304_v36  ;;  %v259_v53 = vrot.slane %v258_v45, 1  ;;  %v312_v54 = vadd.f32 %v311_v46, %v310_v38  ;;  %v330_v55 = vadd.f32 %v329_v47, %v328_v39 }
  0x56   : > { %v335_v56 = vrot.slane %v334_v48, 2  ;;  %v265_v57 = vrot.slane %v264_v49, 1  ;;  %v283_v58 = vrot.slane %v282_v50, 1  ;;  %v289_v59 = vrot.slane %v288_v51, 1 }
  0x57   : > { %v307_v60 = vrot.slane %v306_v52, 1  ;;  %v260_v61 = vadd.f32 %v259_v53, %v258_v45  ;;  %v313_v62 = vrot.slane %v312_v54, 1  ;;  %v331_v63 = vrot.slane %v330_v55, 1 }
  0x58   : > { %v336_v0 = vadd.f32 %v335_v56, %v334_v48  ;;  %v266_v1 = vadd.f32 %v265_v57, %v264_v49  ;;  %v284_v2 = vadd.f32 %v283_v58, %v282_v50  ;;  %v290_v3 = vadd.f32 %v289_v59, %v288_v51 }
  0x59   : > { %v308_v4 = vadd.f32 %v307_v60, %v306_v52  ;;  %v271_v5 = vadd.f32 %v912_v10, %v260_v61  ;;  %v314_v6 = vadd.f32 %v313_v62, %v312_v54  ;;  %v332_v7 = vadd.f32 %v331_v63, %v330_v55 }
  0x5a   : > { %v337_v8 = vrot.slane %v336_v0, 1  ;;  %v272_v9 = vadd.f32 %v912_v10, %v266_v1  ;;  %v295_v11 = vadd.f32 %v914_v13, %v284_v2  ;;  %v296_v12 = vadd.f32 %v914_v13, %v290_v3 }
  0x5b   : > { %v319_v14 = vadd.f32 %v916_v15, %v308_v4  ;;  %273 = vst [vmem:[%s246_s22] sm:$0x1] %v271_v5  ;;  %v320_v16 = vadd.f32 %v916_v15, %v314_v6  ;;  %v343_v17 = vadd.f32 %v918_v24, %v332_v7 }
  0x5c   : > { %v338_v18 = vadd.f32 %v337_v8, %v336_v0  ;;  %274 = vst [vmem:[%s246_s22 + $0x4] sm:$0x1] %v272_v9  ;;  %297 = vst [vmem:[%s246_s22 + $0x1] sm:$0x1] %v295_v11 }
  0x5d   : > { %298 = vst [vmem:[%s246_s22 + $0x5] sm:$0x1] %v296_v12  ;;  %321 = vst [vmem:[%s246_s22 + $0x2] sm:$0x1] %v319_v14 }
  0x5e   : > { %322 = vst [vmem:[%s246_s22 + $0x6] sm:$0x1] %v320_v16  ;;  %345 = vst [vmem:[%s246_s22 + $0x3] sm:$0x1] %v343_v17  ;;  %v344_v10 = vadd.f32 %v918_v24, %v338_v18 }
  0x60   : > { %346 = vst [vmem:[%s246_s22 + $0x7] sm:$0x1] %v344_v10 }
  0x61   : > { %671 = shalt.err (!%p668_p2)
}
  0x62   : > { %s672_s28 = scalar_lea.hbm %s934_s8, 128  ;;  %s676_s30 = scalar_lea.hbm %s986_s3, 256 }
  0x63   : > { %p673_p9 = scmp.ne.s32.totalorder %s934_s8, %s672_s28  ;;  %p677_p0 = scmp.lt.s32.totalorder %s934_s8, %s986_s3 }
  0x64   : > { %p678_p7 = scmp.lt.s32.totalorder %s676_s30, %s672_s28 }
  0x65   : > { %p674_p12 = pnand %p673_p9, %p870_p3 }
  0x66   : > { %p679_p5 = por %p678_p7, %p677_p0 }
  0x67   : > { %p675_p13 = pneg %p674_p12 }
  0x69   : > { %p680_p1 = pnand %p679_p5, %p675_p13 }
  0x6b   : > { %683 = shalt.err (!%p680_p1)
}
  0x6c   : > { %s750_s22 = smov 64   ;;  %s751_s5 = smov 4  }
  0x6d   : > { %501 = dma.vmem_to_hbm [thread:$0]  (%p870_p3), %s929_s24, 128, %s934_s8, %s348_s9, %s750_s22, %s750_s22, %s751_s5  }
  0x6e PF: > { %s377_s15 = sand.u32 1, %s722_s12   ;;  %p997_p4 = scmp.ne.s32.totalorder %s991_s23, 0 }
  0x6f   : > { %p998_p6 = scmp.ge.s32.totalorder %s742_s17, 2  ;;  %s378_s7 = scalar_lea.sflag [#allocation4], %s377_s15 }
  0x71   : > { %p515_p8 = pnand %p998_p6, %p997_p4 }
  0x73   : > { %p516_p10 = pneg %p515_p8 }
  0x75   : > { %717 = dma.done.wait (%p516_p10), %s378_s7, 128  }
  0x76   : > { %719 = vsyncadd (%p516_p10), %s378_s7, 4294967168  ;;  %s20_s17 = sadd.s32 1, %s742_s17   ;;  %s999_s12 = smov %s726_s13 }
  0x77   : > { %p17_p11 = scmp.ge.s32.totalorder %s20_s17, 4   ;;  %s1000_s13 = smov %s730_s14 }
  0x78   : > { %s1001_s14 = smov %s879_s29  ;;  %s1002_s15 = smov %s738_s16 }
  0x79   : > { %s1003_s16 = smov %s1005_s11  ;;  %19 = sbr.rel (!%p17_p11) target bundleno = 7 (0x7), region = 90 }
  0x7e   :  { %383 = vsyncpa [#allocation3], 1 }
  0x7f   :  { %385 = vsyncpa [#allocation3 + $0x1], 1 }
  0x80   :  { %386 = vsyncpa [#allocation6], 1 }
  0x81   :  { %387 = vsyncpa [#allocation4], 1 }
  0x82   :  { %389 = vsyncpa [#allocation4 + $0x1], 1 }

</bundles_post_ra>
